<compile_context>
chip_gen: v7x
topology: tpu7x:2x2x1
jax: 0.10.0
libtpu: 0.0.40
codegen_flags: <defaults>
</compile_context>

<pallas_src>
import jax
import jax.numpy as jnp
from jax.experimental import pallas as pl
from jax.experimental.pallas import tpu as pltpu

_LANES = 128      # TPU vreg lane width (fast axis)
_SUBLANES = 8     # f32 sublane grain
_MAX_TILE_ROWS = 512  # 512x128 f32 = 256 KiB/tile; ~1 MiB resident with in+out
                      # double buffering -> safe on v7x (64 MiB VMEM), near HBM
                      # roofline on v5e/v6e/v7x.


def _identity_copy_kernel(w_ref, o_ref):
    # Pure identity: copy the parameter tile through VMEM.
    o_ref[...] = w_ref[...]


def _round_up(x, m):
    return ((x + m - 1) // m) * m


@jax.jit
def identity_layer_forward(weight: jax.Array) -> jax.Array:
    """Pallas implementation of IdentityLayer.forward(): returns the weight.

    NOTE: the optimal implementation is `return weight` (zero cost). The Pallas
    path below exists for API parity and is tiled/aliased/lane-dense so the
    overhead it adds is the minimum a kernel can have.
    """
    orig_shape = weight.shape
    orig_dtype = weight.dtype
    n = weight.size

    # ---- layout: flatten to a lane-dense (rows, 128) slab -------------------
    rows_needed = pl.cdiv(n, _LANES)
    tile_rows = min(_MAX_TILE_ROWS, _round_up(rows_needed, _SUBLANES))
    total_rows = _round_up(rows_needed, tile_rows)
    n_pad = total_rows * _LANES

    flat = weight.reshape(-1)
    if n_pad != n:
        flat = jnp.pad(flat, (0, n_pad - n))
    x2d = flat.reshape(total_rows, _LANES)

    grid = (total_rows // tile_rows,)

    out2d = pl.pallas_call(
        _identity_copy_kernel,
        out_shape=jax.ShapeDtypeStruct((total_rows, _LANES), orig_dtype),
        grid=grid,
        in_specs=[pl.BlockSpec((tile_rows, _LANES), lambda i: (i, 0))],
        out_specs=pl.BlockSpec((tile_rows, _LANES), lambda i: (i, 0)),
        # Output aliases the (padded, reshaped) input buffer: no second HBM
        # allocation; XLA may elide the round trip entirely.
        input_output_aliases={0: 0},
        compiler_params=pltpu.CompilerParams(
            # Independent row tiles -> shard across the 2 TCs on v7x.
            dimension_semantics=("parallel",),
            vmem_limit_bytes=32 * 1024 * 1024,
        ),
        cost_estimate=pl.CostEstimate(
            flops=0,
            transcendentals=0,
            bytes_accessed=2 * n * jnp.dtype(orig_dtype).itemsize,
        ),
    )(x2d)

    return out2d.reshape(-1)[:n].reshape(orig_shape)


class IdentityLayer:
    """JAX/Pallas port of the PyTorch IdentityLayer."""

    def __init__(self, size, scale=1.0, key=None):
        if key is None:
            key = jax.random.PRNGKey(0)
        # Deterministic init mirroring `scale * torch.randn(size)`.
        self.weight = scale * jax.random.normal(key, size, dtype=jnp.float32)

    def forward(self):
        return identity_layer_forward(self.weight)

    __call__ = forward


if __name__ == "__main__":
    # Small shapes consistent with the cross-entropy test usage:
    # IdentityLayer((batch, seq, vocab)) — batch=2, seq=8, vocab=32.
    batch, seq, vocab = 2, 8, 32
    scale = 1000.0  # the cross-entropy test uses a large scale

    key = jax.random.PRNGKey(0)
    layer = IdentityLayer((batch, seq, vocab), scale=scale, key=key)

    out = layer()
    out = jax.block_until_ready(out)

    # Forward must reproduce the parameter exactly.
    assert out.shape == (batch, seq, vocab)
    assert out.dtype == jnp.float32
    assert bool(jnp.array_equal(out, layer.weight))

    print("KERNEL_OK")
</pallas_src>

<mosaic_0001>
module attributes {stable_mosaic.version = 11 : i64} {
  func.func @_identity_copy_kernel(%arg0: i32, %arg1: memref<8x128xf32, #tpu.memory_space<vmem>>, %arg2: memref<8x128xf32, #tpu.memory_space<vmem>>) attributes {dimension_semantics = [#tpu.dimension_semantics<parallel>], iteration_bounds = array<i64: 1>, scalar_prefetch = 0 : i64, scratch_operands = 0 : i64, tpu.core_type = #tpu.core_type<tc>, window_params = [{transform_indices = @transform_0, window_bounds = array<i64: 8, 128>}, {transform_indices = @transform_1, window_bounds = array<i64: 8, 128>}]} {
    %c0 = arith.constant 0 : index
    %c0_0 = arith.constant 0 : index
    %0 = vector.load %arg1[%c0, %c0_0] : memref<8x128xf32, #tpu.memory_space<vmem>>, vector<8x128xf32>
    %c0_1 = arith.constant 0 : index
    %c0_2 = arith.constant 0 : index
    %1 = vector.load %arg2[%c0_1, %c0_2] : memref<8x128xf32, #tpu.memory_space<vmem>>, vector<8x128xf32>
    tpu.vector_store %arg2[%c0_1, %c0_2], %0 {strides = array<i32>} : memref<8x128xf32, #tpu.memory_space<vmem>>, vector<8x128xf32>,
    return
  }
  func.func @transform_0(%arg0: i32) -> (i32, i32) {
    %c0_i32 = arith.constant 0 : i32
    %c0_i32_0 = arith.constant 0 : i32
    return %arg0, %c0_i32 : i32, i32
  }
  func.func @transform_1(%arg0: i32) -> (i32, i32) {
    %c0_i32 = arith.constant 0 : i32
    %c0_i32_0 = arith.constant 0 : i32
    return %arg0, %c0_i32 : i32, i32
  }
}

</mosaic_0001>

<bundles_post_ra>
// kernel: identity_layer_forward.1
= control target key start
LH: loop header
LB: loop body
LE: loop exit
PB: predicated region body
PF: predicated region fallthrough
CT: control target
= control target key end

     0   :  { %s30_s0 = inlined_call_operand.vmem [shape: f32[8,128], index: 0, kind: input, shape index: {}, may-alias: {0,1}]   ;;  %s31_s1 = inlined_call_operand.vmem [shape: f32[8,128], index: 1, kind: output, shape index: {}, may-alias: {0,1}]  }
   0x1   :  { %v8_v0 = vld [vmem:[%s30_s0] sm:$0xff] }
   0x2   :  { %9 = vst [vmem:[%s31_s1] sm:$0xff] %v8_v0 }

</bundles_post_ra>
